<compile_context>
chip_gen: v7x
topology: tpu7x:2x2x1
jax: 0.10.0
libtpu: 0.0.40
codegen_flags: <defaults>
</compile_context>

<pallas_src>
import functools

import jax
import jax.numpy as jnp
from jax.experimental import pallas as pl
from jax.experimental.pallas import tpu as pltpu

_LANES = 128


def _round_up(x, m):
    return ((x + m - 1) // m) * m


def _ce_kernel(logits_ref, labels_ref, weights_ref, out_ref, *, batch):
    """Accumulates sum(ce) and sum(weights); finalizes to (unweighted_nll, nll)."""
    i = pl.program_id(0)
    nsteps = pl.num_programs(0)

    @pl.when(i == 0)
    def _init():
        out_ref[0, 0] = 0.0   # running sum of per-sample CE
        out_ref[0, 1] = 0.0   # running sum of weights

    logits = logits_ref[...].astype(jnp.float32)        # [TB, C] upcast in vregs
    labels = labels_ref[...]                            # [TB, 1] int32
    weights = weights_ref[...].astype(jnp.float32)      # [TB, 1]
    tb, c = logits.shape

    # Mask rows past the real batch (ragged tail of the last tile).
    row = jax.lax.broadcasted_iota(jnp.int32, (tb, 1), 0)
    valid = (i * tb + row) < batch                      # [TB, 1] bool

    # Per-row cross entropy: logsumexp(logits) - logits[label].
    m = jnp.max(logits, axis=-1, keepdims=True)
    lse = m + jnp.log(jnp.sum(jnp.exp(logits - m), axis=-1, keepdims=True))
    col = jax.lax.broadcasted_iota(jnp.int32, (tb, c), 1)
    picked = jnp.sum(jnp.where(col == labels, logits, 0.0), axis=-1, keepdims=True)
    ce = lse - picked                                   # [TB, 1]
    # TODO(synk): PyTorch CrossEntropyLoss's default ignore_index=-100 is not
    # handled; labels are assumed to be valid class indices in [0, C).

    out_ref[0, 0] += jnp.sum(jnp.where(valid, ce, 0.0))
    out_ref[0, 1] += jnp.sum(jnp.where(valid, weights, 0.0))

    @pl.when(i == nsteps - 1)
    def _finalize():
        unweighted_nll = out_ref[0, 0] * (1.0 / batch)
        out_ref[0, 0] = unweighted_nll
        out_ref[0, 1] = unweighted_nll * (out_ref[0, 1] * (1.0 / batch))


def _l2_kernel(params_ref, bbloc_ref, out_ref, acc_bb_ref, acc_clf_ref,
               *, d, alpha, beta):
    """Accumulates the backbone / classifier L2 sums over lane-dense param tiles."""
    i = pl.program_id(0)
    nsteps = pl.num_programs(0)

    @pl.when(i == 0)
    def _init():
        acc_bb_ref[...] = jnp.zeros_like(acc_bb_ref)
        acc_clf_ref[...] = jnp.zeros_like(acc_clf_ref)

    p = params_ref[...].astype(jnp.float32)             # [TR, 128]
    loc = bbloc_ref[...].astype(jnp.float32)            # [TR, 128] (zeros beyond D)
    tr, lanes = p.shape

    r = jax.lax.broadcasted_iota(jnp.int32, (tr, lanes), 0)
    c = jax.lax.broadcasted_iota(jnp.int32, (tr, lanes), 1)
    flat = (i * tr + r) * lanes + c                     # global flat element index
    is_bb = flat < d

    # loc is zero-padded past D, so diff == p in the classifier region.
    diff = p - loc
    sq = diff * diff
    # Padding elements past the real param count are zeros in both inputs -> add 0.
    acc_bb_ref[...] += jnp.where(is_bb, sq, 0.0)
    acc_clf_ref[...] += jnp.where(is_bb, 0.0, sq)

    @pl.when(i == nsteps - 1)
    def _finalize():
        out_ref[0, 0] = (0.5 * alpha) * jnp.sum(acc_bb_ref[...])
        out_ref[0, 1] = (0.5 * beta) * jnp.sum(acc_clf_ref[...])


def l2sp_loss(logits, labels, weights, params, bb_loc, alpha, beta,
              *, block_b=None, block_rows=None,
              vmem_limit_bytes=32 * 1024 * 1024):
    """Returns (loss, nll, bb_log_prob, clf_log_prob, unweighted_nll) as f32 scalars."""
    b, c = logits.shape
    d = bb_loc.shape[0]
    p_total = params.shape[0]

    # ------------------ CE over the batch (grid over batch tiles) ------------------
    labels2 = labels.reshape(b, 1).astype(jnp.int32)     # tiny
    weights2 = weights.reshape(b, 1).astype(jnp.float32) # tiny

    itemsize = jnp.dtype(logits.dtype).itemsize
    # Keep each (double-buffered) logits block around <=4 MiB -> safe on v7x too.
    rows_budget = max(8, (((4 * 1024 * 1024) // max(1, c * itemsize)) // 8) * 8)
    tb = block_b if block_b is not None else 256
    tb = max(8, min((tb // 8) * 8, _round_up(b, 8), rows_budget))
    nb = -(-b // tb)

    ce_out = pl.pallas_call(
        functools.partial(_ce_kernel, batch=b),
        out_shape=jax.ShapeDtypeStruct((1, 2), jnp.float32),
        grid=(nb,),
        in_specs=[
            pl.BlockSpec((tb, c), lambda i: (i, 0)),
            pl.BlockSpec((tb, 1), lambda i: (i, 0)),
            pl.BlockSpec((tb, 1), lambda i: (i, 0)),
        ],
        out_specs=pl.BlockSpec((1, 2), lambda i: (0, 0),
                               memory_space=pltpu.MemorySpace.SMEM),
        compiler_params=pltpu.CompilerParams(
            dimension_semantics=("arbitrary",),
            vmem_limit_bytes=vmem_limit_bytes),
    )(logits, labels2, weights2)

    # -------------- L2 terms over params (grid over lane-dense row tiles) ----------
    rows_min = -(-p_total // _LANES)
    tr = block_rows if block_rows is not None else 512
    tr = max(8, min((tr // 8) * 8, _round_up(rows_min, 8)))
    rows = _round_up(rows_min, tr)
    p_pad = rows * _LANES
    npt = rows // tr

    params_pad = params if p_pad == p_total else jnp.pad(params, (0, p_pad - p_total))
    bbloc_pad = jnp.pad(bb_loc, (0, p_pad - d))          # zeros in the classifier/pad region
    params2 = params_pad.reshape(rows, _LANES)           # lane/sublane-dense layout
    bbloc2 = bbloc_pad.reshape(rows, _LANES)

    l2_out = pl.pallas_call(
        functools.partial(_l2_kernel, d=d, alpha=float(alpha), beta=float(beta)),
        out_shape=jax.ShapeDtypeStruct((1, 2), jnp.float32),
        grid=(npt,),
        in_specs=[
            pl.BlockSpec((tr, _LANES), lambda i: (i, 0)),
            pl.BlockSpec((tr, _LANES), lambda i: (i, 0)),
        ],
        out_specs=pl.BlockSpec((1, 2), lambda i: (0, 0),
                               memory_space=pltpu.MemorySpace.SMEM),
        scratch_shapes=[pltpu.VMEM((tr, _LANES), jnp.float32),
                        pltpu.VMEM((tr, _LANES), jnp.float32)],
        compiler_params=pltpu.CompilerParams(
            dimension_semantics=("arbitrary",),
            vmem_limit_bytes=vmem_limit_bytes),
    )(params2, bbloc2)

    unweighted_nll = ce_out[0, 0]
    nll = ce_out[0, 1]
    bb_log_prob = l2_out[0, 0]
    clf_log_prob = l2_out[0, 1]
    loss = nll + bb_log_prob + clf_log_prob
    return loss, nll, bb_log_prob, clf_log_prob, unweighted_nll


if __name__ == "__main__":
    key = jax.random.PRNGKey(0)
    k1, k2, k3, k4, k5 = jax.random.split(key, 5)

    B, C = 16, 32          # batch, num classes
    D, P = 48, 80          # backbone param count (len(bb_loc)), total param count
    alpha, beta = 0.01, 0.1

    logits = jax.random.normal(k1, (B, C), dtype=jnp.float32)
    labels = jax.random.randint(k2, (B,), 0, C, dtype=jnp.int32)
    weights = jax.random.uniform(k3, (B,), dtype=jnp.float32)
    params = jax.random.normal(k4, (P,), dtype=jnp.float32) * 0.1
    bb_loc = jax.random.normal(k5, (D,), dtype=jnp.float32) * 0.1

    outs = l2sp_loss(logits, labels, weights, params, bb_loc, alpha, beta)
    outs = jax.block_until_ready(outs)

    # Pure-JAX reference check (same math as the PyTorch forward).
    logp = jax.nn.log_softmax(logits, axis=-1)
    ce = -jnp.take_along_axis(logp, labels[:, None], axis=-1)[:, 0]
    unweighted_ref = ce.mean()
    nll_ref = (unweighted_ref * weights).mean()
    bb_ref = alpha / 2.0 * jnp.sum((params[:D] - bb_loc) ** 2)
    clf_ref = beta / 2.0 * jnp.sum(params[D:] ** 2)
    loss_ref = nll_ref + bb_ref + clf_ref
    expected = jnp.stack([loss_ref, nll_ref, bb_ref, clf_ref, unweighted_ref])
    got = jnp.stack(list(outs))
    assert jnp.allclose(got, expected, atol=1e-5, rtol=1e-5), (got, expected)

    print("KERNEL_OK")
</pallas_src>

<mosaic_0001>
module attributes {stable_mosaic.version = 11 : i64} {
  func.func @_ce_kernel(%arg0: i32, %arg1: memref<16x32xf32, #tpu.memory_space<vmem>>, %arg2: memref<16x1xi32, #tpu.memory_space<vmem>>, %arg3: memref<16x1xf32, #tpu.memory_space<vmem>>, %arg4: memref<1x2xf32, #tpu.memory_space<smem>>) attributes {dimension_semantics = [#tpu.dimension_semantics<arbitrary>], iteration_bounds = array<i64: 1>, scalar_prefetch = 0 : i64, scratch_operands = 0 : i64, tpu.core_type = #tpu.core_type<tc>, window_params = [{transform_indices = @transform_0, window_bounds = array<i64: 16, 32>}, {transform_indices = @transform_1, window_bounds = array<i64: 16, 1>}, {transform_indices = @transform_2, window_bounds = array<i64: 16, 1>}, {transform_indices = @transform_3, window_bounds = array<i64: 1, 2>}]} {
    %c0_i32 = arith.constant 0 : i32
    %0 = arith.cmpi eq, %arg0, %c0_i32 : i32
    %1 = arith.extui %0 : i1 to i32
    %c0_i32_0 = arith.constant 0 : i32
    %2 = arith.cmpi ne, %1, %c0_i32_0 : i32
    scf.if %2 {
      %cst_23 = arith.constant 0.000000e+00 : f32
      %c0_24 = arith.constant 0 : index
      %c0_25 = arith.constant 0 : index
      %50 = memref.load %arg4[%c0_24, %c0_25] : memref<1x2xf32, #tpu.memory_space<smem>>
      memref.store %cst_23, %arg4[%c0_24, %c0_25] : memref<1x2xf32, #tpu.memory_space<smem>>
      %cst_26 = arith.constant 0.000000e+00 : f32
      %c0_27 = arith.constant 0 : index
      %c1_28 = arith.constant 1 : index
      %51 = memref.load %arg4[%c0_27, %c1_28] : memref<1x2xf32, #tpu.memory_space<smem>>
      memref.store %cst_26, %arg4[%c0_27, %c1_28] : memref<1x2xf32, #tpu.memory_space<smem>>
    } else {
    }
    %c0 = arith.constant 0 : index
    %c0_1 = arith.constant 0 : index
    %3 = vector.load %arg1[%c0, %c0_1] : memref<16x32xf32, #tpu.memory_space<vmem>>, vector<16x32xf32>
    %c0_2 = arith.constant 0 : index
    %c0_3 = arith.constant 0 : index
    %4 = vector.load %arg2[%c0_2, %c0_3] : memref<16x1xi32, #tpu.memory_space<vmem>>, vector<16x1xi32>
    %c0_4 = arith.constant 0 : index
    %c0_5 = arith.constant 0 : index
    %5 = vector.load %arg3[%c0_4, %c0_5] : memref<16x1xf32, #tpu.memory_space<vmem>>, vector<16x1xf32>
    %6 = tpu.iota {dimensions = array<i32: 0>} : vector<16x1xi32>
    %c16_i32 = arith.constant 16 : i32
    %7 = arith.muli %arg0, %c16_i32 : i32
    %8 = vector.broadcast %7 : i32 to vector<16x1xi32>
    %9 = arith.addi %8, %6 : vector<16x1xi32>
    %c16_i32_6 = arith.constant 16 : i32
    %10 = vector.broadcast %c16_i32_6 : i32 to vector<16x1xi32>
    %11 = arith.cmpi slt, %9, %10 : vector<16x1xi32>
    %cst = arith.constant dense<0xFF800000> : vector<16xf32>
    %12 = vector.multi_reduction <maximumf>, %3, %cst [1] : vector<16x32xf32> to vector<16xf32>
    %13 = vector.shape_cast %12 : vector<16xf32> to vector<16x1xf32>
    %14 = vector.broadcast %13 : vector<16x1xf32> to vector<16x32xf32>
    %15 = arith.subf %3, %14 : vector<16x32xf32>
    %16 = math.exp %15 : vector<16x32xf32>
    %cst_7 = arith.constant dense<0.000000e+00> : vector<16xf32>
    %17 = vector.multi_reduction <add>, %16, %cst_7 [1] : vector<16x32xf32> to vector<16xf32>
    %18 = vector.shape_cast %17 : vector<16xf32> to vector<16x1xf32>
    %19 = math.log %18 : vector<16x1xf32>
    %20 = arith.addf %13, %19 : vector<16x1xf32>
    %21 = tpu.iota {dimensions = array<i32: 1>} : vector<16x32xi32>
    %22 = vector.broadcast %4 : vector<16x1xi32> to vector<16x32xi32>
    %23 = arith.cmpi eq, %21, %22 : vector<16x32xi32>
    %cst_8 = arith.constant 0.000000e+00 : f32
    %24 = vector.broadcast %cst_8 : f32 to vector<16x32xf32>
    %25 = arith.select %23, %3, %24 : vector<16x32xi1>, vector<16x32xf32>
    %cst_9 = arith.constant dense<0.000000e+00> : vector<16xf32>
    %26 = vector.multi_reduction <add>, %25, %cst_9 [1] : vector<16x32xf32> to vector<16xf32>
    %27 = vector.shape_cast %26 : vector<16xf32> to vector<16x1xf32>
    %28 = arith.subf %20, %27 : vector<16x1xf32>
    %c0_10 = arith.constant 0 : index
    %c0_11 = arith.constant 0 : index
    %29 = memref.load %arg4[%c0_10, %c0_11] : memref<1x2xf32, #tpu.memory_space<smem>>
    %cst_12 = arith.constant 0.000000e+00 : f32
    %30 = vector.broadcast %cst_12 : f32 to vector<16x1xf32>
    %31 = arith.select %11, %28, %30 : vector<16x1xi1>, vector<16x1xf32>
    %32 = vector.shape_cast %31 : vector<16x1xf32> to vector<1x16x1xf32>
    %cst_13 = arith.constant dense<0.000000e+00> : vector<1xf32>
    %33 = vector.multi_reduction <add>, %32, %cst_13 [1, 2] : vector<1x16x1xf32> to vector<1xf32>
    %34 = vector.shape_cast %33 : vector<1xf32> to vector<1x1x1xf32>
    %35 = vector.extract %34[0, 0, 0] : f32 from vector<1x1x1xf32>
    %36 = arith.addf %29, %35 : f32
    %c0_14 = arith.constant 0 : index
    %c0_15 = arith.constant 0 : index
    %37 = memref.load %arg4[%c0_14, %c0_15] : memref<1x2xf32, #tpu.memory_space<smem>>
    memref.store %36, %arg4[%c0_14, %c0_15] : memref<1x2xf32, #tpu.memory_space<smem>>
    %c0_16 = arith.constant 0 : index
    %c1 = arith.constant 1 : index
    %38 = memref.load %arg4[%c0_16, %c1] : memref<1x2xf32, #tpu.memory_space<smem>>
    %cst_17 = arith.constant 0.000000e+00 : f32
    %39 = vector.broadcast %cst_17 : f32 to vector<16x1xf32>
    %40 = arith.select %11, %5, %39 : vector<16x1xi1>, vector<16x1xf32>
    %41 = vector.shape_cast %40 : vector<16x1xf32> to vector<1x16x1xf32>
    %cst_18 = arith.constant dense<0.000000e+00> : vector<1xf32>
    %42 = vector.multi_reduction <add>, %41, %cst_18 [1, 2] : vector<1x16x1xf32> to vector<1xf32>
    %43 = vector.shape_cast %42 : vector<1xf32> to vector<1x1x1xf32>
    %44 = vector.extract %43[0, 0, 0] : f32 from vector<1x1x1xf32>
    %45 = arith.addf %38, %44 : f32
    %c0_19 = arith.constant 0 : index
    %c1_20 = arith.constant 1 : index
    %46 = memref.load %arg4[%c0_19, %c1_20] : memref<1x2xf32, #tpu.memory_space<smem>>
    memref.store %45, %arg4[%c0_19, %c1_20] : memref<1x2xf32, #tpu.memory_space<smem>>
    %c0_i32_21 = arith.constant 0 : i32
    %47 = arith.cmpi eq, %arg0, %c0_i32_21 : i32
    %48 = arith.extui %47 : i1 to i32
    %c0_i32_22 = arith.constant 0 : i32
    %49 = arith.cmpi ne, %48, %c0_i32_22 : i32
    scf.if %49 {
      %c0_23 = arith.constant 0 : index
      %c0_24 = arith.constant 0 : index
      %50 = memref.load %arg4[%c0_23, %c0_24] : memref<1x2xf32, #tpu.memory_space<smem>>
      %cst_25 = arith.constant 6.250000e-02 : f32
      %51 = arith.mulf %50, %cst_25 : f32
      %c0_26 = arith.constant 0 : index
      %c0_27 = arith.constant 0 : index
      %52 = memref.load %arg4[%c0_26, %c0_27] : memref<1x2xf32, #tpu.memory_space<smem>>
      memref.store %51, %arg4[%c0_26, %c0_27] : memref<1x2xf32, #tpu.memory_space<smem>>
      %c0_28 = arith.constant 0 : index
      %c1_29 = arith.constant 1 : index
      %53 = memref.load %arg4[%c0_28, %c1_29] : memref<1x2xf32, #tpu.memory_space<smem>>
      %cst_30 = arith.constant 6.250000e-02 : f32
      %54 = arith.mulf %53, %cst_30 : f32
      %55 = arith.mulf %51, %54 : f32
      %c0_31 = arith.constant 0 : index
      %c1_32 = arith.constant 1 : index
      %56 = memref.load %arg4[%c0_31, %c1_32] : memref<1x2xf32, #tpu.memory_space<smem>>
      memref.store %55, %arg4[%c0_31, %c1_32] : memref<1x2xf32, #tpu.memory_space<smem>>
    } else {
    }
    return
  }
  func.func @transform_0(%arg0: i32) -> (i32, i32) {
    %c0_i32 = arith.constant 0 : i32
    %c0_i32_0 = arith.constant 0 : i32
    return %arg0, %c0_i32 : i32, i32
  }
  func.func @transform_1(%arg0: i32) -> (i32, i32) {
    %c0_i32 = arith.constant 0 : i32
    %c0_i32_0 = arith.constant 0 : i32
    return %arg0, %c0_i32 : i32, i32
  }
  func.func @transform_2(%arg0: i32) -> (i32, i32) {
    %c0_i32 = arith.constant 0 : i32
    %c0_i32_0 = arith.constant 0 : i32
    return %arg0, %c0_i32 : i32, i32
  }
  func.func @transform_3(%arg0: i32) -> (i32, i32) {
    %c0_i32 = arith.constant 0 : i32
    %c0_i32_0 = arith.constant 0 : i32
    %c0_i32_1 = arith.constant 0 : i32
    return %c0_i32, %c0_i32_0 : i32, i32
  }
}

</mosaic_0001>

<bundles_post_ra>
// kernel: tpu_custom_call.1
= control target key start
LH: loop header
LB: loop body
LE: loop exit
PB: predicated region body
PF: predicated region fallthrough
CT: control target
= control target key end

     0   :  { %vm38_vm0 = vcmask 261120   ;;  %v174_v4 = vmov 0   ;;  %s232_s0 = inlined_call_operand.vmem [shape: f32[16,32], index: 0, kind: input, shape index: {}]   ;;  %s233_s1 = inlined_call_operand.vmem [shape: s32[16,1], index: 1, kind: input, shape index: {}]   ;;  %s234_s2 = inlined_call_operand.vmem [shape: f32[16,1], index: 2, kind: input, shape index: {}]   ;;  %s235_s3 = inlined_call_operand.hbm [shape: f32[1,2], index: 3, kind: output, shape index: {}]  }
   0x1   :  { %v23_v0 = vld [vmem:[%s232_s0] sm:$0xff]  ;;  %v24_v1 = vld [vmem:[%s232_s0 + $0x8] sm:$0xff]  ;;  %152 = vset.pattern.permute.xlu1 %v174_v4  ;;  %153 = vset.pattern.permute.xlu0 %v174_v4 }
   0x2   :  { %v25_v2 = vld [vmem:[%s233_s1] sm:$0xff]  ;;  %v39_v3 = vsel %vm38_vm0, %v23_v0, -inf }
   0x3   :  { %8 = vsyncpa [#allocation3], 0  ;;  %40 = vmax.xlane.f32.xlu0 %v39_v3  ;;  %66 = vperm.xlu1 %152, %v25_v2   ;;  %v42_v5 = vsel %vm38_vm0, %v24_v1, -inf  ;;  %v26_v6 = vld [vmem:[%s233_s1 + $0x8] sm:$0xff]  ;;  %v63_v11 = vlaneseq  ;;  %vm86_vm3 = vcmask 7168   ;;  %v27_v36 = vld [vmem:[%s234_s2] sm:$0xff] }
   0x4   :  { %v28_v37 = vld [vmem:[%s234_s2 + $0x8] sm:$0xff]  ;;  %v105_v41 = vsel %vm86_vm3, %v27_v36, 0.0  ;;  %s162_s28 = scalar_lea.hbm %s235_s3, 16 }
   0x5   :  { %v64_v15 = vand.u32 127, %v63_v11  ;;  %v106_v42 = vsel %vm86_vm3, %v28_v37, 0.0  ;;  %p163_p0 = scmp.ne.s32.totalorder %s235_s3, %s162_s28  ;;  %p166_p1 = scmp.lt.u32.totalorder %s162_s28, %s235_s3 }
   0x6   :  { %v107_v44 = vadd.f32 %v106_v42, %v105_v41 }
   0x7   :  { %43 = vmax.xlane.f32.xlu0 %v42_v5  ;;  %69 = vperm.xlu1 %152, %v26_v6   ;;  %p168_p2 = pnand %p166_p1, %p163_p0 }
  0x82   :  { %v67_v14 = vpop.permute.xlu1 %66 }
  0x83   :  { %vm71_vm1 = vcmp.eq.s32.totalorder %v64_v15, %v67_v14 }
  0x84   :  { %v73_v18 = vsel %vm71_vm1, %v23_v0, 0.0 }
  0x85   :  { %v75_v20 = vsel %vm38_vm0, %v73_v18, 0.0 }
  0x86   :  { %v70_v16 = vpop.permute.xlu1 %69 }
  0x87   :  { %vm72_vm2 = vcmp.eq.s32.totalorder %v64_v15, %v70_v16 }
  0x88   :  { %v74_v22 = vsel %vm72_vm2, %v24_v1, 0.0 }
  0x89   :  { %v78_v24 = vsel %vm38_vm0, %v74_v22, 0.0 }
  0x90   :  { %v41_v7 = vpop.xlane.xlu0 %40 }
  0x91   :  { %v45_v8 = vsub.f32 %v23_v0, %v41_v7 }
  0x93   :  { %v47_v9 = vmul.f32 1.442695, %v45_v8 }
  0x94   :  { %v44_v10 = vpop.xlane.xlu0 %43 }
  0x95   :  { %154 = vpow2.f32 %v47_v9  ;;  %v46_v12 = vsub.f32 %v24_v1, %v44_v10 }
  0x97   :  { %v49_v13 = vmul.f32 1.442695, %v46_v12 }
  0x99   :  { %156 = vpow2.f32 %v49_v13 }
  0x9f   :  { %v155_v17 = vpop.eup %154 }
  0xa0   :  { %v51_v19 = vsel %vm38_vm0, %v155_v17, 0.0 }
  0xa1   :  { %52 = vadd.xlane.f32.xlu0 %v51_v19 }
  0xa3   :  { %v157_v21 = vpop.eup %156 }
  0xa4   :  { %v54_v23 = vsel %vm38_vm0, %v157_v21, 0.0 }
  0xa5   :  { %55 = vadd.xlane.f32.xlu1 %v54_v23  ;;  %76 = vadd.xlane.f32.xlu0 %v75_v20 }
  0xa9   :  { %79 = vadd.xlane.f32.xlu0 %v78_v24 }
 0x12e   :  { %v53_v25 = vpop.xlane.xlu0 %52 }
 0x12f   :  { %158 = vlog2.f32 %v53_v25 }
 0x132   :  { %v56_v26 = vpop.xlane.xlu1 %55  ;;  %v77_v29 = vpop.xlane.xlu0 %76 }
 0x133   :  { %160 = vlog2.f32 %v56_v26 }
 0x136   :  { %v80_v35 = vpop.xlane.xlu0 %79 }
 0x139   :  { %v159_v27 = vpop.eup %158 }
 0x13a   :  { %v58_v28 = vmul.f32 0.6931472, %v159_v27 }
 0x13c   :  { %v61_v30 = vadd.f32 %v58_v28, %v41_v7 }
 0x13d   :  { %v161_v31 = vpop.eup %160 }
 0x13e   :  { %v60_v32 = vmul.f32 0.6931472, %v161_v31  ;;  %v81_v33 = vsub.f32 %v61_v30, %v77_v29 }
 0x140   :  { %v62_v34 = vadd.f32 %v60_v32, %v44_v10  ;;  %v87_v39 = vsel %vm86_vm3, %v81_v33, 0.0 }
 0x142   :  { %v82_v38 = vsub.f32 %v62_v34, %v80_v35 }
 0x144   :  { %v88_v40 = vsel %vm86_vm3, %v82_v38, 0.0 }
 0x145   :  { %v89_v43 = vadd.f32 %v88_v40, %v87_v39 }
 0x147   :  { %90 = vadd.xlane.f32.xlu0 %v89_v43 }
 0x14b   :  { %108 = vadd.xlane.f32.xlu0 %v107_v44 }
 0x1d4   :  { %v91_v45 = vpop.xlane.xlu0 %90 }
 0x1d5   :  { %v92_v46 = vrot.slane %v91_v45, 4 }
 0x1d7   :  { %v93_v47 = vadd.f32 %v92_v46, %v91_v45 }
 0x1d8   :  { %v109_v48 = vpop.xlane.xlu0 %108 }
 0x1d9   :  { %v94_v49 = vrot.slane %v93_v47, 2  ;;  %v110_v50 = vrot.slane %v109_v48, 4 }
 0x1db   :  { %v111_v51 = vadd.f32 %v110_v50, %v109_v48  ;;  %v95_v52 = vadd.f32 %v94_v49, %v93_v47 }
 0x1dd   :  { %v112_v53 = vrot.slane %v111_v51, 2  ;;  %v96_v54 = vrot.slane %v95_v52, 1 }
 0x1df   :  { %v113_v55 = vadd.f32 %v112_v53, %v111_v51  ;;  %v97_v56 = vadd.f32 %v96_v54, %v95_v52 }
 0x1e1   :  { %145 = vpush %v97_v56  ;;  %v114_v57 = vrot.slane %v113_v55, 1 }
 0x1e3   :  { %v115_v58 = vadd.f32 %v114_v57, %v113_v55 }
 0x1e5   :  { %147 = vpush %v115_v58 }
 0x212   :  { %s146_s2 = spop %145 }
 0x213   :  { %s124_s22 = smul.f32 0.0625, %s146_s2 }
 0x215   :  { %125 = sst [smem:[#allocation2]] %s124_s22 }
 0x216   :  { %s148_s23 = spop %147 }
 0x217   :  { %s127_s24 = smul.f32 0.0625, %s148_s23 }
 0x219   :  { %s128_s25 = smul.f32 %s127_s24, %s124_s22 }
 0x21b   :  { %129 = sst [smem:[#allocation2 + $0x1]] %s128_s25 }
 0x21c   :  { %171 = shalt.err (!%p168_p2)
}
 0x21d   :  { %s175_s6 = smov [#allocation2]  }
 0x21e   :  { %137 = dma.smem_to_hbm %s175_s6, 16, %s235_s3, [#allocation3]  }
 0x21f   :  { %172 = dma.done.wait [#allocation3], 16  }
 0x220   :  { %173 = vsyncadd [#allocation3], 4294967280 }
 0x221   :  { %141 = sfence }
 0x222   :  { %142 = vsyncpa [#allocation3], 1 }

</bundles_post_ra>
